<compile_context>
chip_gen: v7x
topology: tpu7x:2x2x1
jax: 0.10.0
libtpu: 0.0.40
codegen_flags: <defaults>
</compile_context>

<pallas_src>
import functools

import jax
import jax.numpy as jnp
from jax.experimental import pallas as pl
from jax.experimental.pallas import tpu as pltpu


def _round_up(n: int, m: int) -> int:
    return ((n + m - 1) // m) * m


def _cdiv(a: int, b: int) -> int:
    return (a + b - 1) // b


def _linear_kernel(x_ref, w_ref, b_ref, o_ref):
    # x_ref: (TB, D), w_ref: (D, O_pad), b_ref: (1, O_pad) f32,
    # o_ref: (TB, O_pad) f32.  Single MXU matmul with f32 accumulation; bias
    # add and store stay in f32.
    acc = jnp.dot(x_ref[...], w_ref[...], preferred_element_type=jnp.float32)
    o_ref[...] = acc + b_ref[...]


# Below this element count the pallas launch is pure overhead; use plain XLA.
_MIN_PALLAS_ELEMS = 1 << 18


@functools.partial(jax.jit, static_argnames=("block_b", "force_pallas"))
def classifier_nn_forward(x, w, b, *, block_b: int = 4096,
                          force_pallas: bool = False):
    """Forward pass: out = x @ w + b.

    x: (B, D)   w: (D, O) (transpose of PyTorch fc1.weight, O = 2)   b: (O,)
    """
    B, D = x.shape
    Dw, O = w.shape
    assert Dw == D, (Dw, D)

    # Tiny problem: let XLA fuse a plain dot into the producer instead.
    if not force_pallas and B * D < _MIN_PALLAS_ELEMS:
        out = jnp.dot(x, w, preferred_element_type=jnp.float32)
        return (out + b.astype(jnp.float32)).astype(x.dtype)

    itemsize = jnp.dtype(x.dtype).itemsize

    # Output padded only to a sublane multiple (8); last dim == full array dim.
    O_pad = max(_round_up(O, 8), 8)

    # VMEM footprint per block row (VMEM tiles are lane-padded to 128).
    x_row_bytes = _round_up(D, 128) * itemsize
    o_row_bytes = _round_up(O_pad, 128) * 4
    budget = 16 * 1024 * 1024  # double-buffered x + out blocks stay under this
    tb_cap = max(8, (budget // (2 * (x_row_bytes + o_row_bytes))) // 8 * 8)

    # Balanced tile size: minimal batch over-padding, capped by VMEM budget.
    tb_max = max(8, (min(block_b, tb_cap) // 8) * 8)
    n_tiles = max(1, _cdiv(B, tb_max))
    TB = _round_up(_cdiv(B, n_tiles), 8)
    B_pad = _round_up(B, TB)
    grid = (B_pad // TB,)

    # Only the batch axis is padded (zero rows -> sliced off afterwards);
    # weight/bias padded to O_pad columns (zeros => exact math).
    xp = jnp.pad(x, ((0, B_pad - B), (0, 0)))
    wp = jnp.pad(w.astype(x.dtype), ((0, 0), (0, O_pad - O)))
    bp = jnp.pad(b.astype(jnp.float32), (0, O_pad - O)).reshape(1, O_pad)

    # Actual double-buffered VMEM need; tight limit, capped at 32 MiB (v7x).
    vmem_need = (
        2 * TB * (x_row_bytes + o_row_bytes)                      # x + out bufs
        + 2 * _round_up(D, 8) * _round_up(O_pad, 128) * itemsize  # weight bufs
        + 2 * _round_up(O_pad, 128) * 4                           # bias bufs
    )
    vmem_limit = int(min(32 * 1024 * 1024,
                         max(2 * vmem_need, 4 * 1024 * 1024)))

    # True (unpadded) work, so XLA schedules neighbors sensibly.
    cost = pl.CostEstimate(
        flops=2 * B * D * O,
        transcendentals=0,
        bytes_accessed=B * D * itemsize + D * O * itemsize + O * 4 + B * O * 4,
    )

    out = pl.pallas_call(
        _linear_kernel,
        out_shape=jax.ShapeDtypeStruct((B_pad, O_pad), jnp.float32),
        grid_spec=pltpu.PrefetchScalarGridSpec(
            num_scalar_prefetch=0,
            grid=grid,
            in_specs=[
                pl.BlockSpec((TB, D), lambda i: (i, 0)),     # x, real D
                pl.BlockSpec((D, O_pad), lambda i: (0, 0)),  # weight, resident
                pl.BlockSpec((1, O_pad), lambda i: (0, 0)),  # bias, resident
            ],
            out_specs=pl.BlockSpec((TB, O_pad), lambda i: (i, 0)),
        ),
        compiler_params=pltpu.CompilerParams(
            dimension_semantics=("parallel",),   # >=2 tiles span both v7x TCs
            vmem_limit_bytes=vmem_limit,
        ),
        cost_estimate=cost,
    )(xp, wp, bp)

    return out[:B, :O].astype(x.dtype)


def init_params(key, D, out_features=2):
    """Deterministic init mimicking PyTorch nn.Linear default init."""
    kw, kb = jax.random.split(key)
    bound = 1.0 / jnp.sqrt(jnp.float32(D))
    # PyTorch weight is (out, in); keep it transposed (in, out) for the kernel.
    w = jax.random.uniform(kw, (D, out_features), jnp.float32, -bound, bound)
    b = jax.random.uniform(kb, (out_features,), jnp.float32, -bound, bound)
    return w, b


if __name__ == "__main__":
    key = jax.random.PRNGKey(0)
    kx, kp, kx2, kp2 = jax.random.split(key, 4)

    # Spec shape: nn.Linear(32, 2), batch 8.  force_pallas=True exercises the
    # Pallas kernel even though this size would normally take the fused path.
    B, D = 8, 32
    x = jax.random.normal(kx, (B, D), jnp.float32)
    w, b = init_params(kp, D)
    out = classifier_nn_forward(x, w, b, force_pallas=True)
    jax.block_until_ready(out)
    ref = x @ w + b
    assert out.shape == (B, 2), out.shape
    assert jnp.allclose(out, ref, atol=1e-4, rtol=1e-4)

    # Larger shape: multi-step parallel batch grid, B not a tile multiple,
    # D not a multiple of 128 (exercises the unpadded-D BlockSpec path).
    B2, D2 = 1000, 96
    x2 = jax.random.normal(kx2, (B2, D2), jnp.float32)
    w2, b2 = init_params(kp2, D2)
    out2 = classifier_nn_forward(x2, w2, b2, block_b=256, force_pallas=True)
    jax.block_until_ready(out2)
    ref2 = x2 @ w2 + b2
    assert out2.shape == (B2, 2), out2.shape
    assert jnp.allclose(out2, ref2, atol=1e-4, rtol=1e-4)

    print("KERNEL_OK")
</pallas_src>

<mosaic_0001>
module attributes {stable_mosaic.version = 11 : i64} {
  func.func @_linear_kernel(%arg0: i32, %arg1: memref<8x32xf32, #tpu.memory_space<vmem>>, %arg2: memref<32x8xf32, #tpu.memory_space<vmem>>, %arg3: memref<1x8xf32, #tpu.memory_space<vmem>>, %arg4: memref<8x8xf32, #tpu.memory_space<vmem>>) attributes {dimension_semantics = [#tpu.dimension_semantics<parallel>], iteration_bounds = array<i64: 1>, scalar_prefetch = 0 : i64, scratch_operands = 0 : i64, tpu.core_type = #tpu.core_type<tc>, window_params = [{transform_indices = @transform_0, window_bounds = array<i64: 8, 32>}, {pipeline_mode = #tpu.pipeline_mode<synchronous>, transform_indices = @transform_1, window_bounds = array<i64: 32, 8>}, {pipeline_mode = #tpu.pipeline_mode<synchronous>, transform_indices = @transform_2, window_bounds = array<i64: 1, 8>}, {transform_indices = @transform_3, window_bounds = array<i64: 8, 8>}]} {
    %c0 = arith.constant 0 : index
    %c0_0 = arith.constant 0 : index
    %0 = vector.load %arg1[%c0, %c0_0] : memref<8x32xf32, #tpu.memory_space<vmem>>, vector<8x32xf32>
    %c0_1 = arith.constant 0 : index
    %c0_2 = arith.constant 0 : index
    %1 = vector.load %arg2[%c0_1, %c0_2] : memref<32x8xf32, #tpu.memory_space<vmem>>, vector<32x8xf32>
    %cst = arith.constant dense<0.000000e+00> : vector<8x8xf32>
    %2 = tpu.matmul %0, %1, %cst {dimension_numbers = #tpu.dot_dimension_numbers<[1], [0], [0], [1], [0, 0, 1, 1], [], []>} : vector<8x32xf32>, vector<32x8xf32>, vector<8x8xf32> -> vector<8x8xf32>
    %c0_3 = arith.constant 0 : index
    %c0_4 = arith.constant 0 : index
    %3 = vector.load %arg3[%c0_3, %c0_4] : memref<1x8xf32, #tpu.memory_space<vmem>>, vector<1x8xf32>
    %4 = vector.broadcast %3 : vector<1x8xf32> to vector<8x8xf32>
    %5 = arith.addf %2, %4 : vector<8x8xf32>
    %c0_5 = arith.constant 0 : index
    %c0_6 = arith.constant 0 : index
    %6 = vector.load %arg4[%c0_5, %c0_6] : memref<8x8xf32, #tpu.memory_space<vmem>>, vector<8x8xf32>
    tpu.vector_store %arg4[%c0_5, %c0_6], %5 {strides = array<i32>} : memref<8x8xf32, #tpu.memory_space<vmem>>, vector<8x8xf32>,
    return
  }
  func.func @transform_0(%arg0: i32) -> (i32, i32) {
    %c0_i32 = arith.constant 0 : i32
    %c0_i32_0 = arith.constant 0 : i32
    return %arg0, %c0_i32 : i32, i32
  }
  func.func @transform_1(%arg0: i32) -> (i32, i32) {
    %c0_i32 = arith.constant 0 : i32
    %c0_i32_0 = arith.constant 0 : i32
    %c0_i32_1 = arith.constant 0 : i32
    return %c0_i32, %c0_i32_0 : i32, i32
  }
  func.func @transform_2(%arg0: i32) -> (i32, i32) {
    %c0_i32 = arith.constant 0 : i32
    %c0_i32_0 = arith.constant 0 : i32
    %c0_i32_1 = arith.constant 0 : i32
    return %c0_i32, %c0_i32_0 : i32, i32
  }
  func.func @transform_3(%arg0: i32) -> (i32, i32) {
    %c0_i32 = arith.constant 0 : i32
    %c0_i32_0 = arith.constant 0 : i32
    return %arg0, %c0_i32 : i32, i32
  }
}

</mosaic_0001>

<bundles_post_ra>
// kernel: classifier_nn_forward.1
= control target key start
LH: loop header
LB: loop body
LE: loop exit
PB: predicated region body
PF: predicated region fallthrough
CT: control target
= control target key end

     0   :  { %v133_v0 = vmov 0.0|0.0   ;;  %vm134_vm0 = vmmov 0   ;;  %v135_v4 = vmov 0.0   ;;  %vm26_vm1 = vcmask 261120   ;;  %s177_s1 = inlined_call_operand.vmem [shape: f32[32,8], index: 1, kind: input, shape index: {}]   ;;  %s178_s0 = inlined_call_operand.vmem [shape: f32[8,32], index: 0, kind: input, shape index: {}]   ;;  %s179_s2 = inlined_call_operand.vmem [shape: f32[1,8], index: 2, kind: input, shape index: {}]   ;;  %s180_s3 = inlined_call_operand.vmem [shape: f32[8,8], index: 3, kind: output, shape index: {}]  }
   0x1   :  { %124 = vmatprep.subr.bf16.mxu0 %v133_v0  ;;  %v15_v1 = vld [vmem:[%s177_s1] sm:$0xff]  ;;  %v16_v2 = vld [vmem:[%s177_s1 + $0x8] sm:$0xff]  ;;  %v17_v3 = vld [vmem:[%s177_s1 + $0x10] sm:$0xff]  ;;  %121 = vmatprep.mubr.msk.f32.mxu0 %vm134_vm0, %v135_v4  ;;  %vm100_vm2 = vcmask 64512  }
   0x2   :  { %v125_v5 = vpack.c.bf16 %v16_v2, %v15_v1  ;;  %v18_v6 = vld [vmem:[%s177_s1 + $0x18] sm:$0xff]  ;;  %v14_v8 = vld [vmem:[%s178_s0] sm:$0xff] }
   0x3   :  { %v128_v7 = vpack.c.bf16 %v18_v6, %v17_v3  ;;  %v106_v9 = vld [vmem:[%s179_s2] ss:$0 sm:$0xff] }
   0x4   :  { %126 = vmatpush3.bf16.msra.mxu0 %v125_v5 }
   0x5   :  { %127 = vmatprep.subr.bf16.mxu0 %v133_v0 }
   0x8   :  { %129 = vmatpush3.bf16.msra.mxu0 %v128_v7 }
   0xb   :  { %122 = vmatmul.mubr.msk.f32.vlgmr.msra.gmra.mrb[0].mxu0 %vm26_vm1, %v14_v8 }
  0xde   :  { %v96_v10 = vpop.f32.mrb[0].mxu0 }
  0xdf   :  { %v97_v11 = vadd.f32 %v106_v9, %v96_v10  ;;  %v123_v12 = vpop.f32.mrb[1].mxu0 }
  0xe1   :  { %101 = vst.msk [vmem:[%s180_s3] sm:$0xff] %vm100_vm2, %v97_v11 }

</bundles_post_ra>
